<compile_context>
chip_gen: v7x
topology: tpu7x:2x2x1
jax: 0.10.0
libtpu: 0.0.40
codegen_flags: <defaults>
</compile_context>

<pallas_src>
import jax
import jax.numpy as jnp
from jax.experimental import pallas as pl
from jax.experimental.pallas import tpu as pltpu

BN_EPS = 1e-5


def _round_up(x, m):
    return ((x + m - 1) // m) * m


def _tpu_generation_info():
    """(num_tensorcores_per_chip, vmem_budget_bytes) for tiling decisions."""
    num_tc = 1
    vmem_budget = 64 << 20          # v5e / v6e: 128 MiB physical, budget half
    try:
        kind = jax.devices()[0].device_kind.lower()
        if "v7" in kind:
            num_tc = 2
            vmem_budget = 28 << 20  # v7x: 64 MiB physical, keep well under
    except Exception:
        pass
    return num_tc, vmem_budget


def _vmem_bytes(n_pad, k_pad, tk, te):
    """Conservative VMEM estimate for one grid step (double-buffered inputs)."""
    x_bytes = 2 * n_pad * k_pad * 2      # resident bf16 activations
    w_bytes = 2 * tk * te * 2            # double-buffered bf16 weight tile
    gb_bytes = 2 * 8 * te * 4            # packed gamma/beta slab
    acc_bytes = n_pad * te * 4           # f32 accumulator scratch
    out_bytes = 2 * n_pad * te * 4       # output tile
    return x_bytes + w_bytes + gb_bytes + acc_bytes + out_bytes


def _select_tiles(n_pad, k_pad, e_pad, num_tc, vmem_budget):
    """Pick (tk, te): big K tiles to amortize per-step overhead, E split across
    TensorCores on multi-TC chips, everything within the VMEM budget."""
    if num_tc >= 2 and e_pad % (num_tc * 128) == 0:
        te_pref = e_pad // num_tc
    else:
        te_pref = e_pad
    te_cands = []
    t = te_pref
    while t >= 128 and e_pad % t == 0:
        te_cands.append(t)
        if t % 2 != 0 or (t // 2) % 128 != 0:
            break
        t //= 2
    tk_cands = []
    for c in (k_pad, 9216, 4608, 2304, 2048, 1536, 1024, 512, 256, 128):
        if c <= k_pad and k_pad % c == 0 and c not in tk_cands:
            tk_cands.append(c)
    for te in te_cands:
        for tk in tk_cands:
            if _vmem_bytes(n_pad, k_pad, tk, te) <= vmem_budget:
                return tk, te
    return tk_cands[-1], te_cands[-1]


def prepare_encoder_params(w, gamma, beta, bias=None):
    """One-time (model-load) parameter prep: transpose/pad/cast the Linear
    weight to a lane-aligned bf16 slab and pack gamma/beta into one f32 slab.

    w     : (E, K)  PyTorch nn.Linear weight layout
    gamma : (E,)    BatchNorm1d weight
    beta  : (E,)    BatchNorm1d bias
    bias  : (E,)    Linear bias -- mathematically a no-op before train-mode
                    BatchNorm (cancels in y - mean), so it is ignored.
    """
    del bias  # cancels exactly under train-mode BatchNorm; dropping is exact.
    E, K = w.shape
    k_pad = _round_up(K, 128)
    e_pad = _round_up(E, 128)
    w_p = jnp.zeros((k_pad, e_pad), jnp.bfloat16).at[:K, :E].set(
        jnp.asarray(w).T.astype(jnp.bfloat16))
    gb_p = jnp.zeros((8, e_pad), jnp.float32)
    gb_p = gb_p.at[0, :E].set(jnp.asarray(gamma, jnp.float32))
    gb_p = gb_p.at[1, :E].set(jnp.asarray(beta, jnp.float32))
    return {"w_p": w_p, "gb_p": gb_p, "K": K, "E": E,
            "k_pad": k_pad, "e_pad": e_pad}


def _make_head_kernel(n_valid, n_pad, tk):
    """Kernel: K-tiled (pooled @ W) accumulation + BatchNorm1d finalize."""
    inv_n = 1.0 / float(n_valid)

    def kernel(x_ref, w_ref, gb_ref, out_ref, acc_ref):
        k = pl.program_id(1)

        @pl.when(k == 0)
        def _init():
            acc_ref[...] = jnp.zeros_like(acc_ref)

        # x is VMEM-resident (one DMA total); slice its K window here.
        k0 = pl.multiple_of(k * tk, tk)
        acc_ref[...] += jnp.dot(x_ref[:, pl.ds(k0, tk)], w_ref[...],
                                preferred_element_type=jnp.float32)

        @pl.when(k == pl.num_programs(1) - 1)
        def _finalize():
            y = acc_ref[...]                                   # (n_pad, te) f32
            # BatchNorm1d, training mode: biased batch statistics over the
            # n_valid real rows only (padded rows masked out).
            row_ids = jax.lax.broadcasted_iota(jnp.int32, (n_pad, 1), 0)
            mask = (row_ids < n_valid).astype(jnp.float32)
            mean = jnp.sum(y * mask, axis=0, keepdims=True) * inv_n
            centered = (y - mean) * mask
            var = jnp.sum(centered * centered, axis=0, keepdims=True) * inv_n
            yhat = (y - mean) * jax.lax.rsqrt(var + BN_EPS)
            out_ref[...] = yhat * gb_ref[0:1, :] + gb_ref[1:2, :]

    return kernel


def encoder_cnn_forward(features, params):
    """features: (N, C, H, W) f32 feature map from the ResNet-152 backbone.
    params: output of prepare_encoder_params (pre-padded bf16 weight etc.)."""
    # TODO(synk): pretrained ResNet-152 backbone (models.resnet152) is a
    # checkpoint-loaded feature extractor; `features` stands in for its output.
    N, C, H, W = features.shape
    if N < 2:
        raise ValueError("BatchNorm1d in training mode requires batch size >= 2")
    Hp, Wp = H // 2, W // 2                    # MaxPool2d(2,2) floors odd H/W
    K = C * Hp * Wp
    if K != params["K"]:
        raise ValueError(f"feature dim {K} != Linear in_features {params['K']}")
    E, k_pad, e_pad = params["E"], params["k_pad"], params["e_pad"]

    # ---- MaxPool2d(2, stride=2) + flatten (PyTorch (c, h, w) order), in XLA
    # (fuses; avoids materializing a 4x window tensor in HBM).
    xr = features[:, :, : 2 * Hp, : 2 * Wp].astype(jnp.float32)
    xr = xr.reshape(N, C, Hp, 2, Wp, 2)
    pooled = jnp.max(jnp.max(xr, axis=5), axis=3).reshape(N, K)

    # ---- Batch padding: 8 sublanes for small batches, 16 (bf16 packing) above.
    n_pad = max(_round_up(N, 8), 8) if N <= 8 else _round_up(N, 16)
    x_p = pooled.astype(jnp.bfloat16)
    if n_pad != N or k_pad != K:
        x_p = jnp.pad(x_p, ((0, n_pad - N), (0, k_pad - K)))

    # ---- Generation-aware tiling + VMEM budget.
    num_tc, vmem_budget = _tpu_generation_info()
    tk, te = _select_tiles(n_pad, k_pad, e_pad, num_tc, vmem_budget)
    vmem_need = _vmem_bytes(n_pad, k_pad, tk, te)
    vmem_limit = int(min(max(vmem_need + (4 << 20), 16 << 20),
                         vmem_budget + (8 << 20)))

    grid = (e_pad // te, k_pad // tk)   # (parallel E tiles, arbitrary K reduce)
    kernel = _make_head_kernel(N, n_pad, tk)

    out_p = pl.pallas_call(
        kernel,
        out_shape=jax.ShapeDtypeStruct((n_pad, e_pad), jnp.float32),
        grid_spec=pltpu.PrefetchScalarGridSpec(
            num_scalar_prefetch=0,
            grid=grid,
            in_specs=[
                # pooled activations: fully VMEM-resident (DMA'd once).
                pl.BlockSpec((n_pad, k_pad), lambda e, k: (0, 0)),
                # weight tile: the only real HBM stream.
                pl.BlockSpec((tk, te), lambda e, k: (k, e)),
                # packed gamma/beta slab.
                pl.BlockSpec((8, te), lambda e, k: (0, e)),
            ],
            out_specs=pl.BlockSpec((n_pad, te), lambda e, k: (0, e)),
            scratch_shapes=[pltpu.VMEM((n_pad, te), jnp.float32)],
        ),
        compiler_params=pltpu.CompilerParams(
            dimension_semantics=("parallel", "arbitrary"),
            vmem_limit_bytes=vmem_limit,
        ),
    )(x_p, params["w_p"], params["gb_p"])

    return out_p[:N, :E]


def _reference(features, w, b, gamma, beta):
    """Pure-JAX reference mirroring the PyTorch forward (bf16 matmul operands
    to match the kernel's streaming precision; f32 accumulate).  w is in
    PyTorch (E, K) layout; the Linear bias is applied here exactly as PyTorch
    does (it cancels under train-mode BatchNorm, matching the kernel)."""
    N, C, H, W = features.shape
    Hp, Wp = H // 2, W // 2
    xr = features[:, :, : 2 * Hp, : 2 * Wp].reshape(N, C, Hp, 2, Wp, 2)
    pooled = jnp.max(jnp.max(xr, axis=5), axis=3).reshape(N, -1)
    y = jnp.dot(pooled.astype(jnp.bfloat16), w.T.astype(jnp.bfloat16),
                preferred_element_type=jnp.float32) + b
    mean = jnp.mean(y, axis=0, keepdims=True)
    var = jnp.mean((y - mean) ** 2, axis=0, keepdims=True)
    return (y - mean) * jax.lax.rsqrt(var + BN_EPS) * gamma + beta
    # NOTE: BatchNorm1d running_mean / running_var momentum updates are not
    # produced (forward output only).


if __name__ == "__main__":
    # Small synthetic shapes consistent with the module's forward:
    #   backbone features (N, C, H, W) -> maxpool 2x2 -> flatten (K=C*Hp*Wp)
    #   -> Linear(K, embed_size) -> BatchNorm1d(embed_size)
    N, C, H, W = 2, 4, 16, 16
    embed_size = 32
    K = C * (H // 2) * (W // 2)

    key = jax.random.PRNGKey(0)
    k_feat, k_w = jax.random.split(key)
    features = jax.random.normal(k_feat, (N, C, H, W), dtype=jnp.float32)

    # init_weights(): linear.weight ~ N(0, 0.02), linear.bias = 0,
    # BN gamma = 1, beta = 0.  Weight kept in PyTorch (E, K) layout.
    w = 0.02 * jax.random.normal(k_w, (embed_size, K), dtype=jnp.float32)
    b = jnp.zeros((embed_size,), dtype=jnp.float32)
    gamma = jnp.ones((embed_size,), dtype=jnp.float32)
    beta = jnp.zeros((embed_size,), dtype=jnp.float32)

    # One-time parameter prep (model-load time), then the forward.
    params = prepare_encoder_params(w, gamma, beta, bias=b)
    out = encoder_cnn_forward(features, params)
    jax.block_until_ready(out)

    ref = _reference(features, w, b, gamma, beta)
    assert out.shape == (N, embed_size)
    assert jnp.allclose(out, ref, atol=2e-3, rtol=2e-3), "mismatch vs reference"
    print("KERNEL_OK")
</pallas_src>

<mosaic_0001>
module attributes {stable_mosaic.version = 11 : i64} {
  func.func @kernel(%arg0: i32, %arg1: i32, %arg2: memref<8x256xbf16, #tpu.memory_space<vmem>>, %arg3: memref<256x128xbf16, #tpu.memory_space<vmem>>, %arg4: memref<8x128xf32, #tpu.memory_space<vmem>>, %arg5: memref<8x128xf32, #tpu.memory_space<vmem>>, %arg6: memref<8x128xf32, #tpu.memory_space<vmem>>) attributes {dimension_semantics = [#tpu.dimension_semantics<parallel>, #tpu.dimension_semantics<arbitrary>], iteration_bounds = array<i64: 1, 1>, scalar_prefetch = 0 : i64, scratch_operands = 1 : i64, tpu.core_type = #tpu.core_type<tc>, window_params = [{pipeline_mode = #tpu.pipeline_mode<synchronous>, transform_indices = @transform_0, window_bounds = array<i64: 8, 256>}, {transform_indices = @transform_1, window_bounds = array<i64: 256, 128>}, {transform_indices = @transform_2, window_bounds = array<i64: 8, 128>}, {transform_indices = @transform_3, window_bounds = array<i64: 8, 128>}]} {
    %c0_i32 = arith.constant 0 : i32
    %0 = arith.cmpi eq, %arg1, %c0_i32 : i32
    %1 = arith.extui %0 : i1 to i32
    %c0_i32_0 = arith.constant 0 : i32
    %2 = arith.cmpi ne, %1, %c0_i32_0 : i32
    scf.if %2 {
      %cst_9 = arith.constant 0.000000e+00 : f32
      %15 = vector.broadcast %cst_9 : f32 to vector<8x128xf32>
      %c0_10 = arith.constant 0 : index
      %c0_11 = arith.constant 0 : index
      %16 = vector.load %arg6[%c0_10, %c0_11] : memref<8x128xf32, #tpu.memory_space<vmem>>, vector<8x128xf32>
      tpu.vector_store %arg6[%c0_10, %c0_11], %15 {strides = array<i32>} : memref<8x128xf32, #tpu.memory_space<vmem>>, vector<8x128xf32>,
    } else {
    }
    %c256_i32 = arith.constant 256 : i32
    %3 = arith.muli %arg1, %c256_i32 : i32
    %4 = tpu.assume_multiple %3, 256 : i32
    %c0 = arith.constant 0 : index
    %c0_1 = arith.constant 0 : index
    %5 = vector.load %arg6[%c0, %c0_1] : memref<8x128xf32, #tpu.memory_space<vmem>>, vector<8x128xf32>
    %c0_2 = arith.constant 0 : index
    %6 = arith.index_cast %4 : i32 to index
    %7 = vector.load %arg2[%c0_2, %6] : memref<8x256xbf16, #tpu.memory_space<vmem>>, vector<8x256xbf16>
    %c0_3 = arith.constant 0 : index
    %c0_4 = arith.constant 0 : index
    %8 = vector.load %arg3[%c0_3, %c0_4] : memref<256x128xbf16, #tpu.memory_space<vmem>>, vector<256x128xbf16>
    %cst = arith.constant dense<0.000000e+00> : vector<8x128xf32>
    %9 = tpu.matmul %7, %8, %cst {dimension_numbers = #tpu.dot_dimension_numbers<[1], [0], [0], [1], [0, 0, 1, 1], [], []>} : vector<8x256xbf16>, vector<256x128xbf16>, vector<8x128xf32> -> vector<8x128xf32>
    %10 = arith.addf %5, %9 : vector<8x128xf32>
    %c0_5 = arith.constant 0 : index
    %c0_6 = arith.constant 0 : index
    %11 = vector.load %arg6[%c0_5, %c0_6] : memref<8x128xf32, #tpu.memory_space<vmem>>, vector<8x128xf32>
    tpu.vector_store %arg6[%c0_5, %c0_6], %10 {strides = array<i32>} : memref<8x128xf32, #tpu.memory_space<vmem>>, vector<8x128xf32>,
    %c0_i32_7 = arith.constant 0 : i32
    %12 = arith.cmpi eq, %arg1, %c0_i32_7 : i32
    %13 = arith.extui %12 : i1 to i32
    %c0_i32_8 = arith.constant 0 : i32
    %14 = arith.cmpi ne, %13, %c0_i32_8 : i32
    scf.if %14 {
      %c0_9 = arith.constant 0 : index
      %c0_10 = arith.constant 0 : index
      %15 = vector.load %arg6[%c0_9, %c0_10] : memref<8x128xf32, #tpu.memory_space<vmem>>, vector<8x128xf32>
      %16 = tpu.iota {dimensions = array<i32: 0>} : vector<8x1xi32>
      %c2_i32 = arith.constant 2 : i32
      %17 = vector.broadcast %c2_i32 : i32 to vector<8x1xi32>
      %18 = arith.cmpi slt, %16, %17 : vector<8x1xi32>
      %19 = arith.extui %18 : vector<8x1xi1> to vector<8x1xi32>
      %20 = arith.sitofp %19 : vector<8x1xi32> to vector<8x1xf32>
      %21 = vector.broadcast %20 : vector<8x1xf32> to vector<8x128xf32>
      %22 = arith.mulf %15, %21 : vector<8x128xf32>
      %cst_11 = arith.constant dense<0.000000e+00> : vector<128xf32>
      %23 = vector.multi_reduction <add>, %22, %cst_11 [0] : vector<8x128xf32> to vector<128xf32>
      %24 = vector.shape_cast %23 : vector<128xf32> to vector<1x128xf32>
      %cst_12 = arith.constant 5.000000e-01 : f32
      %25 = vector.broadcast %cst_12 : f32 to vector<1x128xf32>
      %26 = arith.mulf %24, %25 : vector<1x128xf32>
      %27 = vector.broadcast %26 : vector<1x128xf32> to vector<8x128xf32>
      %28 = arith.subf %15, %27 : vector<8x128xf32>
      %29 = vector.broadcast %20 : vector<8x1xf32> to vector<8x128xf32>
      %30 = arith.mulf %28, %29 : vector<8x128xf32>
      %31 = arith.mulf %30, %30 : vector<8x128xf32>
      %cst_13 = arith.constant dense<0.000000e+00> : vector<128xf32>
      %32 = vector.multi_reduction <add>, %31, %cst_13 [0] : vector<8x128xf32> to vector<128xf32>
      %33 = vector.shape_cast %32 : vector<128xf32> to vector<1x128xf32>
      %cst_14 = arith.constant 5.000000e-01 : f32
      %34 = vector.broadcast %cst_14 : f32 to vector<1x128xf32>
      %35 = arith.mulf %33, %34 : vector<1x128xf32>
      %36 = vector.broadcast %26 : vector<1x128xf32> to vector<8x128xf32>
      %37 = arith.subf %15, %36 : vector<8x128xf32>
      %cst_15 = arith.constant 9.99999974E-6 : f32
      %38 = vector.broadcast %cst_15 : f32 to vector<1x128xf32>
      %39 = arith.addf %35, %38 : vector<1x128xf32>
      %40 = math.rsqrt %39 : vector<1x128xf32>
      %41 = vector.broadcast %40 : vector<1x128xf32> to vector<8x128xf32>
      %42 = arith.mulf %37, %41 : vector<8x128xf32>
      %c0_16 = arith.constant 0 : index
      %c0_17 = arith.constant 0 : index
      %43 = vector.load %arg4[%c0_16, %c0_17] : memref<8x128xf32, #tpu.memory_space<vmem>>, vector<1x128xf32>
      %44 = vector.broadcast %43 : vector<1x128xf32> to vector<8x128xf32>
      %45 = arith.mulf %42, %44 : vector<8x128xf32>
      %c1 = arith.constant 1 : index
      %c0_18 = arith.constant 0 : index
      %46 = vector.load %arg4[%c1, %c0_18] : memref<8x128xf32, #tpu.memory_space<vmem>>, vector<1x128xf32>
      %47 = vector.broadcast %46 : vector<1x128xf32> to vector<8x128xf32>
      %48 = arith.addf %45, %47 : vector<8x128xf32>
      %c0_19 = arith.constant 0 : index
      %c0_20 = arith.constant 0 : index
      %49 = vector.load %arg5[%c0_19, %c0_20] : memref<8x128xf32, #tpu.memory_space<vmem>>, vector<8x128xf32>
      tpu.vector_store %arg5[%c0_19, %c0_20], %48 {strides = array<i32>} : memref<8x128xf32, #tpu.memory_space<vmem>>, vector<8x128xf32>,
    } else {
    }
    return
  }
  func.func @transform_0(%arg0: i32, %arg1: i32) -> (i32, i32) {
    %c0_i32 = arith.constant 0 : i32
    %c0_i32_0 = arith.constant 0 : i32
    %c0_i32_1 = arith.constant 0 : i32
    return %c0_i32, %c0_i32_0 : i32, i32
  }
  func.func @transform_1(%arg0: i32, %arg1: i32) -> (i32, i32) {
    %c0_i32 = arith.constant 0 : i32
    return %arg1, %arg0 : i32, i32
  }
  func.func @transform_2(%arg0: i32, %arg1: i32) -> (i32, i32) {
    %c0_i32 = arith.constant 0 : i32
    %c0_i32_0 = arith.constant 0 : i32
    return %c0_i32, %arg0 : i32, i32
  }
  func.func @transform_3(%arg0: i32, %arg1: i32) -> (i32, i32) {
    %c0_i32 = arith.constant 0 : i32
    %c0_i32_0 = arith.constant 0 : i32
    return %c0_i32, %arg0 : i32, i32
  }
}

</mosaic_0001>

<bundles_post_ra>
// kernel: tpu_custom_call.1
= control target key start
LH: loop header
LB: loop body
LE: loop exit
PB: predicated region body
PF: predicated region fallthrough
CT: control target
= control target key end

     0   :  { %8 = vsyncpa [#allocation4], 0  ;;  %s542_s0 = inlined_call_operand.hbm [shape: bf16[8,256], index: 0, kind: input, shape index: {}]   ;;  %s543_s1 = inlined_call_operand.hbm [shape: bf16[256,128], index: 1, kind: input, shape index: {}]   ;;  %s544_s2 = inlined_call_operand.hbm [shape: f32[8,128], index: 2, kind: input, shape index: {}]   ;;  %s545_s3 = inlined_call_operand.hbm [shape: f32[8,128], index: 3, kind: output, shape index: {}]  }
   0x1   :  { %9 = vsyncpa [#allocation7], 0 }
   0x2   :  { %10 = vsyncpa [#allocation5], 0  ;;  %s467_s12 = smov [#allocation6]   ;;  %s373_s16 = scalar_lea.hbm %s543_s1, 2048 }
   0x3   :  { %s26_s13 = sshll.u32 %s467_s12, 4  ;;  %p374_p0 = scmp.ne.s32.totalorder %s543_s1, %s373_s16  ;;  %s27_s13 = int_to_ptr.vmem [resolvable:$true] %s26_s13 }
   0x4   :  { %p377_p1 = scmp.lt.u32.totalorder %s373_s16, %s543_s1 }
   0x6   :  { %p379_p2 = pnand %p377_p1, %p374_p0 }
   0x8   :  { %382 = shalt.err (!%p379_p2)
}
   0x9   :  { %s383_s21 = scalar_lea.vmem %s27_s13, 2048  ;;  %p388_p4 = scmp.lt.s32.totalorder %s27_s13, %s27_s13 }
   0xa   :  { %p384_p3 = scmp.ne.s32.totalorder %s27_s13, %s383_s21  ;;  %p389_p5 = scmp.lt.s32.totalorder %s383_s21, %s383_s21 }
   0xc   :  { %p390_p6 = por %p389_p5, %p388_p4 }
   0xe   :  { %p391_p7 = pnand %p390_p6, %p384_p3 }
  0x10   :  { %394 = shalt.err (!%p391_p7)
}
  0x11   :  { %s468_s22 = smov 64   ;;  %s469_s23 = smov 4  }
  0x12   :  { %32 = dma.hbm_to_vmem [thread:$0]  %s543_s1, 2048, %s27_s13, [#allocation7], %s468_s22, %s468_s22, %s469_s23  }
  0x13   :  { %s470_s26 = smov [#allocation3]   ;;  %s471_s28 = smov [#allocation8]  }
  0x14   :  { %s17_s27 = sshll.u32 %s470_s26, 4  ;;  %s39_s29 = sshll.u32 %s471_s28, 4  ;;  %s18_s27 = int_to_ptr.vmem [resolvable:$true] %s17_s27  ;;  %s40_s29 = int_to_ptr.vmem [resolvable:$true] %s39_s29 }
  0x15   :  { %s395_s5 = scalar_lea.hbm %s542_s0, 128 }
  0x16   :  { %p396_p8 = scmp.ne.s32.totalorder %s542_s0, %s395_s5  ;;  %p399_p9 = scmp.lt.u32.totalorder %s395_s5, %s542_s0 }
  0x18   :  { %p401_p10 = pnand %p399_p9, %p396_p8 }
  0x1a   :  { %404 = shalt.err (!%p401_p10)
}
  0x1b   :  { %s405_s1 = scalar_lea.vmem %s18_s27, 128  ;;  %p410_p12 = scmp.lt.s32.totalorder %s18_s27, %s18_s27 }
  0x1c   :  { %p406_p11 = scmp.ne.s32.totalorder %s18_s27, %s405_s1  ;;  %p411_p13 = scmp.lt.s32.totalorder %s405_s1, %s405_s1 }
  0x1e   :  { %p412_p0 = por %p411_p13, %p410_p12 }
  0x20   :  { %p413_p1 = pnand %p412_p0, %p406_p11 }
  0x22   :  { %416 = shalt.err (!%p413_p1)
}
  0x23   :  { %20 = dma.hbm_to_vmem [thread:$0]  %s542_s0, 128, %s18_s27, [#allocation4]  }
  0x24   :  { %s417_s14 = scalar_lea.hbm %s544_s2, 128 }
  0x25   :  { %p418_p2 = scmp.ne.s32.totalorder %s544_s2, %s417_s14  ;;  %p421_p3 = scmp.lt.u32.totalorder %s417_s14, %s544_s2 }
  0x27   :  { %p423_p4 = pnand %p421_p3, %p418_p2 }
  0x29   :  { %426 = shalt.err (!%p423_p4)
}
  0x2a   :  { %s427_s19 = scalar_lea.vmem %s40_s29, 128  ;;  %p432_p6 = scmp.lt.s32.totalorder %s40_s29, %s40_s29 }
  0x2b   :  { %p428_p5 = scmp.ne.s32.totalorder %s40_s29, %s427_s19  ;;  %p433_p7 = scmp.lt.s32.totalorder %s427_s19, %s427_s19 }
  0x2d   :  { %p434_p8 = por %p433_p7, %p432_p6 }
  0x2f   :  { %p435_p9 = pnand %p434_p8, %p428_p5 }
  0x31   :  { %438 = shalt.err (!%p435_p9)
}
  0x32   :  { %42 = dma.hbm_to_vmem [thread:$0]  %s544_s2, 128, %s40_s29, [#allocation7]  }
  0x33   :  { %461 = dma.done.wait [#allocation4], 128  }
  0x34   :  { %462 = vsyncadd [#allocation4], 4294967168 }
  0x35   :  { %463 = dma.done.wait [#allocation7], 2176  }
  0x36   :  { %464 = vsyncadd [#allocation7], 4294965120  ;;  %v353_v0 = vld [vmem:[#allocation6 + $0x40] sm:$0xff]   ;;  %v355_v2 = vld [vmem:[#allocation6 + $0x48] sm:$0xff]   ;;  %v246_v19 = vlaneseq  ;;  %v472_v23 = vmov 0.0   ;;  %s473_s2 = smov [#allocation9]  }
  0x37   :  { %v354_v1 = vld [vmem:[#allocation6] sm:$0xff]   ;;  %324 = vmatprep.subr.bf16.mxu0 %v353_v0  ;;  %v356_v3 = vld [vmem:[#allocation6 + $0x8] sm:$0xff]   ;;  %v357_v4 = vld [vmem:[#allocation6 + $0x50] sm:$0xff]   ;;  %s291_s21 = sshll.u32 %s473_s2, 4  ;;  %s292_s21 = int_to_ptr.vmem [resolvable:$true] %s291_s21 }
  0x38   :  { %325 = vmatpush3.bf16.msra.mxu0 %v354_v1  ;;  %v358_v5 = vld [vmem:[#allocation6 + $0x10] sm:$0xff]   ;;  %v359_v6 = vld [vmem:[#allocation6 + $0x58] sm:$0xff]   ;;  %v361_v8 = vld [vmem:[#allocation6 + $0x60] sm:$0xff]   ;;  %v247_v20 = vshrl.u32 %v246_v19, 7  ;;  %s439_s22 = scalar_lea.vmem %s292_s21, 128  ;;  %p444_p11 = scmp.lt.s32.totalorder %s292_s21, %s292_s21 }
  0x39   :  { %326 = vmatprep.subr.bf16.mxu0 %v355_v2  ;;  %v360_v7 = vld [vmem:[#allocation6 + $0x18] sm:$0xff]   ;;  %v362_v9 = vld [vmem:[#allocation6 + $0x20] sm:$0xff]   ;;  %v363_v10 = vld [vmem:[#allocation6 + $0x68] sm:$0xff]   ;;  %p440_p10 = scmp.ne.s32.totalorder %s292_s21, %s439_s22  ;;  %p445_p12 = scmp.lt.s32.totalorder %s439_s22, %s439_s22 }
  0x3a   :  { %v64_v11 = vld [vmem:[#allocation3] sm:$0xff]  ;;  %v364_v13 = vld [vmem:[#allocation6 + $0x28] sm:$0xff]   ;;  %v365_v14 = vld [vmem:[#allocation6 + $0x70] sm:$0xff]   ;;  %vm248_vm0 = vcmp.lt.s32.totalorder %v247_v20, 2 }
  0x3b   :  { %v304_v12 = vcombine.high %v64_v11, %v64_v11  ;;  %v366_v15 = vld [vmem:[#allocation6 + $0x30] sm:$0xff]   ;;  %v367_v16 = vld [vmem:[#allocation6 + $0x78] sm:$0xff]   ;;  %v303_v18 = vcombine.low %v64_v11, %v64_v11  ;;  %v321_v24 = vsel %vm248_vm0, 1.0, %v472_v23  ;;  %v322_v48 = vld [vmem:[#allocation8] ss:$0 sm:$0xff]  ;;  %p446_p13 = por %p445_p12, %p444_p11 }
  0x3c   :  { %327 = vmatpush3.bf16.msra.mxu0 %v356_v3  ;;  %v368_v17 = vld [vmem:[#allocation6 + $0x38] sm:$0xff]   ;;  %v323_v50 = vld [vmem:[#allocation8 + $0x1] ss:$0 sm:$0xff] }
  0x3d   :  { %328 = vmatprep.subr.bf16.mxu0 %v357_v4  ;;  %232 = vmatprep.mubr.bf16.mxu0 %v304_v12  ;;  %p447_p0 = pnand %p446_p13, %p440_p10 }
  0x40   :  { %329 = vmatpush3.bf16.msra.mxu0 %v358_v5 }
  0x41   :  { %330 = vmatprep.subr.bf16.mxu0 %v359_v6 }
  0x44   :  { %331 = vmatpush3.bf16.msra.mxu0 %v360_v7 }
  0x45   :  { %332 = vmatprep.subr.bf16.mxu0 %v361_v8 }
  0x48   :  { %333 = vmatpush3.bf16.msra.mxu0 %v362_v9 }
  0x49   :  { %334 = vmatprep.subr.bf16.mxu0 %v363_v10 }
  0x4c   :  { %335 = vmatpush3.bf16.msra.mxu0 %v364_v13 }
  0x4d   :  { %336 = vmatprep.subr.bf16.mxu0 %v365_v14 }
  0x50   :  { %337 = vmatpush3.bf16.msra.mxu0 %v366_v15 }
  0x51   :  { %338 = vmatprep.subr.bf16.mxu0 %v367_v16 }
  0x54   :  { %339 = vmatpush3.bf16.msra.mxu0 %v368_v17 }
  0x57   :  { %233 = vmatmul.mubr.bf16.vlgmr.msra.gmra.mrb[0].mxu0 %v303_v18 }
 0x12a   :  { %v340_v21 = vpop.f32.mrb[0].mxu0 }
 0x12b   :  { %v341_v22 = vpop.f32.mrb[1].mxu0 }
 0x12c   :  { %v342_v25 = vadd.f32 %v341_v22, %v340_v21  ;;  %v343_v26 = vpop.f32.mrb[2].mxu0 }
 0x12d   :  { %v344_v27 = vpop.f32.mrb[3].mxu0 }
 0x12e   :  { %v251_v28 = vmul.f32 %v342_v25, %v321_v24 }
 0x130   :  { %v252_v29 = vrot.slane %v251_v28, 4 }
 0x132   :  { %v253_v30 = vadd.f32 %v252_v29, %v251_v28 }
 0x134   :  { %v254_v31 = vrot.slane %v253_v30, 2 }
 0x136   :  { %v255_v32 = vadd.f32 %v254_v31, %v253_v30 }
 0x138   :  { %v256_v33 = vrot.slane %v255_v32, 1 }
 0x13a   :  { %v257_v34 = vadd.f32 %v256_v33, %v255_v32 }
 0x13c   :  { %v258_v35 = vmul.f32 0.5, %v257_v34 }
 0x13e   :  { %v259_v36 = vsub.f32 %v342_v25, %v258_v35 }
 0x140   :  { %v260_v37 = vmul.f32 %v321_v24, %v259_v36 }
 0x142   :  { %v261_v38 = vmul.f32 %v260_v37, %v260_v37 }
 0x144   :  { %v262_v39 = vrot.slane %v261_v38, 4 }
 0x146   :  { %v263_v40 = vadd.f32 %v262_v39, %v261_v38 }
 0x148   :  { %v264_v41 = vrot.slane %v263_v40, 2 }
 0x14a   :  { %v265_v42 = vadd.f32 %v264_v41, %v263_v40 }
 0x14c   :  { %v266_v43 = vrot.slane %v265_v42, 1 }
 0x14e   :  { %v267_v44 = vadd.f32 %v266_v43, %v265_v42 }
 0x150   :  { %v268_v45 = vmul.f32 0.5, %v267_v44 }
 0x152   :  { %v269_v46 = vadd.f32 1e-05, %v268_v45 }
 0x154   :  { %371 = vrsqrt.f32 %v269_v46 }
 0x15e   :  { %v372_v47 = vpop.eup %371 }
 0x15f   :  { %v271_v49 = vmul.f32 %v372_v47, %v259_v36 }
 0x161   :  { %v277_v51 = vmul.f32 %v322_v48, %v271_v49 }
 0x163   :  { %v283_v52 = vadd.f32 %v323_v50, %v277_v51 }
 0x165   :  { %284 = vst [vmem:[#allocation9] sm:$0xff] %v283_v52 }
 0x166   :  { %450 = shalt.err (!%p447_p0)
}
 0x167   :  { %s451_s25 = scalar_lea.hbm %s545_s3, 128 }
 0x168   :  { %p452_p1 = scmp.ne.s32.totalorder %s545_s3, %s451_s25  ;;  %p455_p2 = scmp.lt.u32.totalorder %s451_s25, %s545_s3 }
 0x16a   :  { %p457_p3 = pnand %p455_p2, %p452_p1 }
 0x16c   :  { %460 = shalt.err (!%p457_p3)
}
 0x16d   :  { %294 = dma.vmem_to_hbm [thread:$0]  %s292_s21, 128, %s545_s3, [#allocation5]  }
 0x16e   :  { %465 = dma.done.wait [#allocation5], 128  }
 0x16f   :  { %466 = vsyncadd [#allocation5], 4294967168 }
 0x170   :  { %298 = vsyncpa [#allocation4], 1 }
 0x171   :  { %299 = vsyncpa [#allocation7], 1 }
 0x172   :  { %300 = vsyncpa [#allocation5], 1 }

</bundles_post_ra>
